<compile_context>
chip_gen: v6e
topology: v6e:2x2x1
jax: 0.10.0
libtpu: 0.0.40
codegen_flags: <defaults>
</compile_context>

<pallas_src>
import functools

import jax
import jax.numpy as jnp
from jax.experimental import pallas as pl
from jax.experimental.pallas import tpu as pltpu


def _lora_linear_kernel(x_ref, w_ref, a_ref, b_ref, o_ref):
    # x:(tm, K)  w:(K, tn)  a:(K, r_pad)  b_scaled:(r_pad, tn)  -> o:(tm, tn)
    x = x_ref[...]                                                     # bf16
    base = jnp.dot(x, w_ref[...], preferred_element_type=jnp.float32)  # MXU, f32 acc
    xa = jnp.dot(x, a_ref[...], preferred_element_type=jnp.float32)    # MXU, low rank
    lora = jnp.dot(xa.astype(x.dtype), b_ref[...],
                   preferred_element_type=jnp.float32)                 # MXU, low rank
    o_ref[...] = (base + lora).astype(o_ref.dtype)


def _choose_tile(dim, preferred, align):
    """Largest tile <= preferred that divides `dim` and is a multiple of `align`
    (falls back to the full dim, which is always a legal block)."""
    if dim <= preferred:
        return dim
    t = (preferred // align) * align
    while t >= align:
        if dim % t == 0:
            return t
        t -= align
    return dim


def lora_linear(x, w, a, b, *, lora_alpha, lora_rank, tm=256, tn=512):
    """Fused LoRA linear: x @ w + (alpha/r) * (x @ a) @ b.

    x: (M, H_in) bf16, w: (H_in, H_out) bf16, a: (H_in, r) bf16, b: (r, H_out) bf16
    -> (M, H_out) bf16. Weights are pre-transposed (row-major x @ W).
    """
    M, H_in = x.shape
    H_out = w.shape[1]
    r = a.shape[1]
    scaling = float(lora_alpha) / float(lora_rank)

    # Fold scaling into B offline (multiply in f32, then cast back).
    b_scaled = (scaling * b.astype(jnp.float32)).astype(b.dtype)

    # Pad the low-rank dim to a lane-dense multiple of 128 (zero pad is exact).
    r_pad = ((r + 127) // 128) * 128
    if r_pad != r:
        a = jnp.pad(a, ((0, 0), (0, r_pad - r)))
        b_scaled = jnp.pad(b_scaled, ((0, r_pad - r), (0, 0)))

    tm = _choose_tile(M, tm, 16)       # token tile (sublane axis, bf16 packing)
    tn = _choose_tile(H_out, tn, 128)  # output-feature tile (lane-dense)
    grid_m = M // tm
    grid_n = H_out // tn

    # Explicit scoped-VMEM budget for the chosen tiles (double-buffered inputs/outputs).
    itemsize = jnp.dtype(x.dtype).itemsize
    tile_bytes = 2 * itemsize * (tm * H_in + H_in * tn + H_in * r_pad
                                 + r_pad * tn + tm * tn)
    vmem_limit = int(min(max(tile_bytes + (8 << 20), 32 << 20), 48 << 20))

    cost = pl.CostEstimate(
        flops=2 * M * H_in * H_out + 2 * M * H_in * r_pad + 2 * M * r_pad * H_out,
        transcendentals=0,
        bytes_accessed=itemsize * (x.size + w.size + a.size + b_scaled.size
                                   + M * H_out),
    )

    # Grid: N outer, M inner -> W block index depends only on n, so each weight
    # column-block is fetched once while x tiles stream past it.
    return pl.pallas_call(
        _lora_linear_kernel,
        out_shape=jax.ShapeDtypeStruct((M, H_out), x.dtype),
        grid_spec=pltpu.PrefetchScalarGridSpec(
            num_scalar_prefetch=0,
            grid=(grid_n, grid_m),
            in_specs=[
                pl.BlockSpec((tm, H_in), lambda n, m: (m, 0)),     # x tile
                pl.BlockSpec((H_in, tn), lambda n, m: (0, n)),     # W column-block
                pl.BlockSpec((H_in, r_pad), lambda n, m: (0, 0)),  # LoRA A (resident)
                pl.BlockSpec((r_pad, tn), lambda n, m: (0, n)),    # scaled LoRA B
            ],
            out_specs=pl.BlockSpec((tm, tn), lambda n, m: (m, n)),
        ),
        compiler_params=pltpu.CompilerParams(
            dimension_semantics=("parallel", "parallel"),
            vmem_limit_bytes=vmem_limit,
        ),
        cost_estimate=cost,
    )(x, w, a, b_scaled)


def lora_linear_ref(x, w, a, b, *, lora_alpha, lora_rank):
    scaling = float(lora_alpha) / float(lora_rank)
    xf = x.astype(jnp.float32)
    out = xf @ w.astype(jnp.float32) + scaling * (
        (xf @ a.astype(jnp.float32)) @ b.astype(jnp.float32))
    return out.astype(x.dtype)


if __name__ == "__main__":
    # Small, StarCoder2-shaped-in-spirit synthetic config.
    batch, seq, hidden = 2, 8, 32
    lora_rank, lora_alpha = 16, 16          # defaults from LoRAModel.__init__
    target_modules = ["q_proj", "v_proj", "k_proj", "o_proj"]

    key = jax.random.PRNGKey(0)
    key, kx = jax.random.split(key)
    # hidden states entering the attention projections
    x = jax.random.normal(kx, (batch, seq, hidden), dtype=jnp.float32)
    x = x.astype(jnp.bfloat16)
    x2d = x.reshape(batch * seq, hidden)    # layout: [M, H]

    # Deterministic parameter init per target module.
    params = {}
    for name in target_modules:
        key, kw, ka = jax.random.split(key, 3)
        w = (jax.random.normal(kw, (hidden, hidden), dtype=jnp.float32)
             / jnp.sqrt(hidden)).astype(jnp.bfloat16)          # base weight (frozen)
        a = (jax.random.normal(ka, (hidden, lora_rank), dtype=jnp.float32)
             / jnp.sqrt(hidden)).astype(jnp.bfloat16)          # lora_A (kaiming-ish)
        b = jnp.zeros((lora_rank, hidden), dtype=jnp.bfloat16)  # lora_B init = 0 (PEFT)
        params[name] = (w, a, b)
    # Make one adapter non-trivial so the LoRA path is actually exercised.
    key, kb = jax.random.split(key)
    w, a, _ = params["q_proj"]
    params["q_proj"] = (w, a,
                        (0.1 * jax.random.normal(kb, (lora_rank, hidden),
                                                 dtype=jnp.float32)).astype(jnp.bfloat16))

    outs = {}
    for name, (w, a, b) in params.items():
        y = lora_linear(x2d, w, a, b, lora_alpha=lora_alpha, lora_rank=lora_rank)
        y = jax.block_until_ready(y)
        y_ref = lora_linear_ref(x2d, w, a, b,
                                lora_alpha=lora_alpha, lora_rank=lora_rank)
        assert y.shape == (batch * seq, hidden) and y.dtype == jnp.bfloat16
        assert jnp.allclose(y.astype(jnp.float32), y_ref.astype(jnp.float32),
                            atol=1e-1, rtol=1e-1), f"mismatch in {name}"
        outs[name] = y.reshape(batch, seq, hidden)

    print("KERNEL_OK")
</pallas_src>

<mosaic_0001>
module attributes {stable_mosaic.version = 11 : i64} {
  func.func @_lora_linear_kernel(%arg0: i32, %arg1: i32, %arg2: memref<16x32xbf16, #tpu.memory_space<vmem>>, %arg3: memref<32x32xbf16, #tpu.memory_space<vmem>>, %arg4: memref<32x128xbf16, #tpu.memory_space<vmem>>, %arg5: memref<128x32xbf16, #tpu.memory_space<vmem>>, %arg6: memref<16x32xbf16, #tpu.memory_space<vmem>>) attributes {dimension_semantics = [#tpu.dimension_semantics<parallel>, #tpu.dimension_semantics<parallel>], iteration_bounds = array<i64: 1, 1>, scalar_prefetch = 0 : i64, scratch_operands = 0 : i64, tpu.core_type = #tpu.core_type<tc>, window_params = [{transform_indices = @transform_0, window_bounds = array<i64: 16, 32>}, {transform_indices = @transform_1, window_bounds = array<i64: 32, 32>}, {pipeline_mode = #tpu.pipeline_mode<synchronous>, transform_indices = @transform_2, window_bounds = array<i64: 32, 128>}, {transform_indices = @transform_3, window_bounds = array<i64: 128, 32>}, {transform_indices = @transform_4, window_bounds = array<i64: 16, 32>}]} {
    %c0 = arith.constant 0 : index
    %c0_0 = arith.constant 0 : index
    %0 = vector.load %arg2[%c0, %c0_0] : memref<16x32xbf16, #tpu.memory_space<vmem>>, vector<16x32xbf16>
    %c0_1 = arith.constant 0 : index
    %c0_2 = arith.constant 0 : index
    %1 = vector.load %arg3[%c0_1, %c0_2] : memref<32x32xbf16, #tpu.memory_space<vmem>>, vector<32x32xbf16>
    %cst = arith.constant dense<0.000000e+00> : vector<16x32xf32>
    %2 = tpu.matmul %0, %1, %cst {dimension_numbers = #tpu.dot_dimension_numbers<[1], [0], [0], [1], [0, 0, 1, 1], [], []>} : vector<16x32xbf16>, vector<32x32xbf16>, vector<16x32xf32> -> vector<16x32xf32>
    %c0_3 = arith.constant 0 : index
    %c0_4 = arith.constant 0 : index
    %3 = vector.load %arg4[%c0_3, %c0_4] : memref<32x128xbf16, #tpu.memory_space<vmem>>, vector<32x128xbf16>
    %cst_5 = arith.constant dense<0.000000e+00> : vector<16x128xf32>
    %4 = tpu.matmul %0, %3, %cst_5 {dimension_numbers = #tpu.dot_dimension_numbers<[1], [0], [0], [1], [0, 0, 1, 1], [], []>} : vector<16x32xbf16>, vector<32x128xbf16>, vector<16x128xf32> -> vector<16x128xf32>
    %5 = arith.truncf %4 : vector<16x128xf32> to vector<16x128xbf16>
    %c0_6 = arith.constant 0 : index
    %c0_7 = arith.constant 0 : index
    %6 = vector.load %arg5[%c0_6, %c0_7] : memref<128x32xbf16, #tpu.memory_space<vmem>>, vector<128x32xbf16>
    %cst_8 = arith.constant dense<0.000000e+00> : vector<16x32xf32>
    %7 = tpu.matmul %5, %6, %cst_8 {dimension_numbers = #tpu.dot_dimension_numbers<[1], [0], [0], [1], [0, 0, 1, 1], [], []>} : vector<16x128xbf16>, vector<128x32xbf16>, vector<16x32xf32> -> vector<16x32xf32>
    %8 = arith.addf %2, %7 : vector<16x32xf32>
    %9 = arith.truncf %8 : vector<16x32xf32> to vector<16x32xbf16>
    %c0_9 = arith.constant 0 : index
    %c0_10 = arith.constant 0 : index
    %10 = vector.load %arg6[%c0_9, %c0_10] : memref<16x32xbf16, #tpu.memory_space<vmem>>, vector<16x32xbf16>
    tpu.vector_store %arg6[%c0_9, %c0_10], %9 {strides = array<i32>} : memref<16x32xbf16, #tpu.memory_space<vmem>>, vector<16x32xbf16>,
    return
  }
  func.func @transform_0(%arg0: i32, %arg1: i32) -> (i32, i32) {
    %c0_i32 = arith.constant 0 : i32
    %c0_i32_0 = arith.constant 0 : i32
    return %arg1, %c0_i32 : i32, i32
  }
  func.func @transform_1(%arg0: i32, %arg1: i32) -> (i32, i32) {
    %c0_i32 = arith.constant 0 : i32
    %c0_i32_0 = arith.constant 0 : i32
    return %c0_i32, %arg0 : i32, i32
  }
  func.func @transform_2(%arg0: i32, %arg1: i32) -> (i32, i32) {
    %c0_i32 = arith.constant 0 : i32
    %c0_i32_0 = arith.constant 0 : i32
    %c0_i32_1 = arith.constant 0 : i32
    return %c0_i32, %c0_i32_0 : i32, i32
  }
  func.func @transform_3(%arg0: i32, %arg1: i32) -> (i32, i32) {
    %c0_i32 = arith.constant 0 : i32
    %c0_i32_0 = arith.constant 0 : i32
    return %c0_i32, %arg0 : i32, i32
  }
  func.func @transform_4(%arg0: i32, %arg1: i32) -> (i32, i32) {
    %c0_i32 = arith.constant 0 : i32
    return %arg1, %arg0 : i32, i32
  }
}

</mosaic_0001>

<bundles_post_ra>
// kernel: tpu_custom_call.1
= control target key start
LH: loop header
LB: loop body
LE: loop exit
PB: predicated region body
PF: predicated region fallthrough
CT: control target
= control target key end

     0   :  { %v387_v1 = vmov 0.0   ;;  %vm388_vm0 = vmmov 0   ;;  %vm46_vm1 = vcmask 261120   ;;  %s464_s0 = inlined_call_operand.vmem [shape: bf16[16,32], index: 0, kind: input, shape index: {}]   ;;  %s465_s1 = inlined_call_operand.vmem [shape: bf16[32,32], index: 1, kind: input, shape index: {}]   ;;  %s466_s2 = inlined_call_operand.vmem [shape: bf16[32,128], index: 2, kind: input, shape index: {}]   ;;  %s467_s3 = inlined_call_operand.vmem [shape: bf16[128,32], index: 3, kind: input, shape index: {}]   ;;  %s468_s4 = inlined_call_operand.hbm [shape: bf16[16,32], index: 4, kind: output, shape index: {}]  }
   0x1   :  { %v352_v0 = vld [vmem:[%s466_s2 + $0x8] sm:$0xff]   ;;  %311 = vmatprep.subr.bf16.mxu0 %v387_v1  ;;  %319 = vmatprep.subr.bf16.mxu1 %v387_v1  ;;  %v353_v2 = vld [vmem:[%s466_s2] sm:$0xff]   ;;  %v355_v3 = vld [vmem:[%s467_s3 + $0x38] sm:$0xff]  }
   0x2   :  { %312 = vmatpush3.bf16.msra.mxu0 %v352_v0  ;;  %315 = vmatprep.mubr.msk.bf16.mxu0 %vm388_vm0, %v387_v1  ;;  %v354_v4 = vld [vmem:[%s464_s0] sm:$0xff]   ;;  %v356_v5 = vld [vmem:[%s467_s3 + $0x30] sm:$0xff]   ;;  %v360_v6 = vld [vmem:[%s465_s1 + $0x8] sm:$0xff]  }
   0x3   :  { %313 = vmatprep.subr.bf16.mxu0 %v387_v1  ;;  %335 = vmatprep.mubr.msk.bf16.mxu1 %vm388_vm0, %v387_v1  ;;  %v357_v7 = vld [vmem:[%s467_s3 + $0x28] sm:$0xff]   ;;  %v362_v8 = vld [vmem:[%s465_s1] sm:$0xff]  }
   0x4   :  { %320 = vmatpush3.bf16.msra.mxu1 %v355_v3 }
   0x5   :  { %321 = vmatprep.subr.bf16.mxu1 %v387_v1 }
   0x6   :  { %314 = vmatpush3.bf16.msra.mxu0 %v353_v2 }
   0x7   :  { %339 = vmatprep.subr.bf16.mxu0 %v387_v1 }
   0x8   :  { %322 = vmatpush3.bf16.msra.mxu1 %v356_v5 }
   0x9   :  { %316 = vmatmul.mubr.msk.bf16.vlgmr.msra.gmra.mxu0 %vm46_vm1, %v354_v4  ;;  %323 = vmatprep.subr.bf16.mxu1 %v387_v1 }
   0xa   :  { %340 = vmatpush3.bf16.msra.mxu0 %v360_v6  ;;  %343 = vmatprep.mubr.msk.bf16.mxu0 %vm388_vm0, %v387_v1 }
   0xb   :  { %341 = vmatprep.subr.bf16.mxu0 %v387_v1 }
   0xc   :  { %9 = vsyncpa [#allocation3], 0  ;;  %324 = vmatpush3.bf16.msra.mxu1 %v357_v7  ;;  %v358_v9 = vld [vmem:[%s467_s3 + $0x20] sm:$0xff]   ;;  %v359_v10 = vld [vmem:[%s467_s3 + $0x18] sm:$0xff]   ;;  %vm258_vm2 = vcmask 257024   ;;  %s389_s12 = smov [#allocation2]  }
   0xd   :  { %325 = vmatprep.subr.bf16.mxu1 %v387_v1  ;;  %v361_v11 = vld [vmem:[%s467_s3 + $0x10] sm:$0xff]   ;;  %v363_v12 = vld [vmem:[%s467_s3 + $0x8] sm:$0xff]   ;;  %v364_v13 = vld [vmem:[%s467_s3] sm:$0xff]   ;;  %s266_s13 = sshll.u32 %s389_s12, 4  ;;  %s267_s13 = int_to_ptr.vmem [resolvable:$true] %s266_s13 }
   0xe   :  { %342 = vmatpush3.bf16.msra.mxu0 %v362_v8  ;;  %s365_s3 = scalar_lea.vmem %s267_s13, 128  ;;  %p370_p1 = scmp.lt.s32.totalorder %s267_s13, %s267_s13 }
   0xf   :  { %p366_p0 = scmp.ne.s32.totalorder %s267_s13, %s365_s3  ;;  %p371_p2 = scmp.lt.s32.totalorder %s365_s3, %s365_s3 }
  0x10   :  { %326 = vmatpush3.bf16.msra.mxu1 %v358_v9 }
  0x11   :  { %344 = vmatmul.mubr.msk.bf16.vlgmr.msra.gmra.mxu0 %vm46_vm1, %v354_v4  ;;  %327 = vmatprep.subr.bf16.mxu1 %v387_v1  ;;  %p372_p3 = por %p371_p2, %p370_p1 }
  0x13   :  { %p373_p4 = pnand %p372_p3, %p366_p0 }
  0x14   :  { %328 = vmatpush3.bf16.msra.mxu1 %v359_v10 }
  0x15   :  { %329 = vmatprep.subr.bf16.mxu1 %v387_v1 }
  0x18   :  { %330 = vmatpush3.bf16.msra.mxu1 %v361_v11 }
  0x19   :  { %331 = vmatprep.subr.bf16.mxu1 %v387_v1 }
  0x1c   :  { %332 = vmatpush3.bf16.msra.mxu1 %v363_v12 }
  0x1d   :  { %333 = vmatprep.subr.bf16.mxu1 %v387_v1 }
  0x20   :  { %334 = vmatpush3.bf16.msra.mxu1 %v364_v13 }
  0xc9   :  { %v84_v14 = vpop.f32.mrf.mxu0 }
  0xcb   :  { %v317_v15 = vpop.f32.mrf.mxu0 }
  0xcd   :  { %v87_v16 = vpop.f32.mrf.mxu0 }
  0xce   :  { %v91_v17 = vpack.c.bf16 %v87_v16, %v84_v14 }
  0xcf   :  { %v318_v18 = vpop.f32.mrf.mxu0 }
  0xd0   :  { %336 = vmatmul.mubr.bf16.vlgmr.msra.gmra.mxu1 %v91_v17 }
  0xd1   :  { %v243_v19 = vpop.f32.mrf.mxu0 }
  0xd3   :  { %v345_v20 = vpop.f32.mrf.mxu0 }
  0xd5   :  { %v246_v21 = vpop.f32.mrf.mxu0 }
  0xd7   :  { %v346_v22 = vpop.f32.mrf.mxu0 }
 0x190   :  { %v190_v23 = vpop.f32.mrf.mxu1 }
 0x191   :  { %v244_v24 = vadd.f32 %v243_v19, %v190_v23 }
 0x192   :  { %v337_v25 = vpop.f32.mrf.mxu1 }
 0x193   :  { %v294_v26 = vpack.c.bf16 %v244_v24, %v244_v24 }
 0x194   :  { %v193_v27 = vpop.f32.mrf.mxu1 }
 0x195   :  { %259 = vst.msk [vmem:[#allocation2] sm:$0xf] %vm258_vm2, %v294_v26  ;;  %v247_v28 = vadd.f32 %v246_v21, %v193_v27 }
 0x196   :  { %v338_v29 = vpop.f32.mrf.mxu1 }
 0x197   :  { %v295_v30 = vpack.c.bf16 %v247_v28, %v247_v28 }
 0x199   :  { %260 = vst.msk [vmem:[#allocation2 + $0x4] sm:$0xf] %vm258_vm2, %v295_v30 }
 0x19a   :  { %376 = shalt.err (!%p373_p4)
}
 0x19b   :  { %s390_s14 = smov 64   ;;  %s391_s15 = smov 4  }
 0x19c   :  { %272 = dma.vmem_to_hbm [thread:$0]  %s267_s13, 128, %s468_s4, [#allocation3], %s390_s14, %s390_s14, %s391_s15  }
 0x19d   :  { %385 = dma.done.wait [#allocation3], 128  }
 0x19e   :  { %386 = vsyncadd [#allocation3], 4294967168 }
 0x19f   :  { %276 = vsyncpa [#allocation3], 1 }

</bundles_post_ra>
